<compile_context>
chip_gen: v7x
topology: tpu7x:2x2x1
jax: 0.10.0
libtpu: 0.0.40
codegen_flags: <defaults>
</compile_context>

<pallas_src>
import jax
import jax.numpy as jnp
from jax.experimental import pallas as pl
from jax.experimental.pallas import tpu as pltpu

_LANE = 128


def _sublane(dtype):
    return {4: 8, 2: 16, 1: 32}.get(jnp.dtype(dtype).itemsize, 8)


def _round_up(x, m):
    return ((x + m - 1) // m) * m


def _pick_tile(total, target, multiple):
    """Largest tile <= target that is a multiple of `multiple` and divides `total`."""
    t = min(target, total)
    t = max(multiple, (t // multiple) * multiple)
    while total % t:
        t -= multiple
    return t


# ---------------------------------------------------------------------------
# Kernels (one grid step computes a (tm, tn) logits tile, K kept whole).
# ---------------------------------------------------------------------------
def _cat_kernel(text_ref, image_ref, wt_ref, wi_ref, b_ref, out_ref):
    acc = jnp.dot(text_ref[...], wt_ref[...], preferred_element_type=jnp.float32)
    acc = acc + jnp.dot(image_ref[...], wi_ref[...], preferred_element_type=jnp.float32)
    out_ref[...] = (acc + b_ref[...]).astype(out_ref.dtype)


def _mul_kernel(text_ref, image_ref, w_ref, b_ref, out_ref):
    fused = (text_ref[...] * image_ref[...]).astype(w_ref.dtype)
    acc = jnp.dot(fused, w_ref[...], preferred_element_type=jnp.float32)
    out_ref[...] = (acc + b_ref[...]).astype(out_ref.dtype)


# ---------------------------------------------------------------------------
# One-time parameter preparation (hoisted out of the per-call path).
# ---------------------------------------------------------------------------
def prepare_cls_head_params(weight, bias, *, fuse, vis_dim, compute_dtype=None):
    """weight: (n_cls, in_fea) PyTorch nn.Linear layout; bias: (n_cls,)."""
    assert fuse in ("cat", "mul")
    n_cls, in_fea = weight.shape
    assert in_fea == (2 * vis_dim if fuse == "cat" else vis_dim)
    if compute_dtype is None:
        compute_dtype = weight.dtype
    compute_dtype = jnp.dtype(compute_dtype)

    n_pad = _round_up(n_cls, _LANE)
    w_t = jnp.asarray(weight).T.astype(compute_dtype)          # (in_fea, n_cls)
    bias_f32 = jnp.asarray(bias, jnp.float32)
    if n_pad != n_cls:
        w_t = jnp.pad(w_t, ((0, 0), (0, n_pad - n_cls)))
        bias_f32 = jnp.pad(bias_f32, (0, n_pad - n_cls))
    bias2d = bias_f32.reshape(1, n_pad)

    if fuse == "cat":
        weights = (w_t[:vis_dim], w_t[vis_dim:])               # two (D, n_pad) halves
    else:
        weights = (w_t,)                                       # (D, n_pad)

    return dict(fuse=fuse, vis_dim=vis_dim, n_cls=n_cls, n_pad=n_pad,
                compute_dtype=compute_dtype, weights=weights, bias2d=bias2d)


# ---------------------------------------------------------------------------
# Per-call forward.
# ---------------------------------------------------------------------------
def cls_head_v1_apply(params, text_fea, image_fea, *, trim_output=True,
                      tm_target=512, tn_target=512):
    fuse = params["fuse"]
    D = params["vis_dim"]
    n_cls = params["n_cls"]
    n_pad = params["n_pad"]
    cdt = params["compute_dtype"]
    weights = params["weights"]
    bias2d = params["bias2d"]

    B, d_in = text_fea.shape
    assert d_in == D and image_fea.shape == (B, D)

    text = text_fea.astype(cdt)
    image = image_fea.astype(cdt)

    sub = _sublane(cdt)
    b_pad = _round_up(B, sub)
    if b_pad != B:
        text = jnp.pad(text, ((0, b_pad - B), (0, 0)))
        image = jnp.pad(image, ((0, b_pad - B), (0, 0)))

    tm = _pick_tile(b_pad, tm_target, sub)
    tn = _pick_tile(n_pad, tn_target, _LANE)
    grid = (b_pad // tm, n_pad // tn)

    act_spec = pl.BlockSpec((tm, D), lambda i, j: (i, 0))
    w_spec = pl.BlockSpec((D, tn), lambda i, j: (0, j))
    b_spec = pl.BlockSpec((1, tn), lambda i, j: (0, j))
    out_spec = pl.BlockSpec((tm, tn), lambda i, j: (i, j))

    if fuse == "cat":
        kernel = _cat_kernel
        in_specs = [act_spec, act_spec, w_spec, w_spec, b_spec]
        operands = (text, image, weights[0], weights[1], bias2d)
        in_fea = 2 * D
    else:
        kernel = _mul_kernel
        in_specs = [act_spec, act_spec, w_spec, b_spec]
        operands = (text, image, weights[0], bias2d)
        in_fea = D

    cbytes = cdt.itemsize
    cost = pl.CostEstimate(
        flops=2 * b_pad * in_fea * n_pad,
        transcendentals=0,
        bytes_accessed=(2 * b_pad * D * cbytes            # activations
                        + in_fea * n_pad * cbytes          # weights
                        + n_pad * 4                        # bias (f32)
                        + b_pad * n_pad * 4),              # logits (f32)
    )

    # Per-tile resident bytes (inputs + f32 output), double-buffered by Pallas.
    n_w = 2 if fuse == "cat" else 1
    tile_bytes = (2 * tm * D + n_w * D * tn) * cbytes + tn * 4 + tm * tn * 4
    vmem_limit = int(min(96 << 20, max(32 << 20, 3 * tile_bytes)))

    out = pl.pallas_call(
        kernel,
        out_shape=jax.ShapeDtypeStruct((b_pad, n_pad), jnp.float32),
        grid=grid,
        in_specs=in_specs,
        out_specs=out_spec,
        compiler_params=pltpu.CompilerParams(
            dimension_semantics=("parallel", "parallel"),
            vmem_limit_bytes=vmem_limit),
        cost_estimate=cost,
    )(*operands)

    if trim_output and (b_pad != B or n_pad != n_cls):
        out = out[:B, :n_cls]
    return out


# ---------------------------------------------------------------------------
# Self-test.
# ---------------------------------------------------------------------------
def _reference(text_fea, image_fea, weight, bias, fuse):
    if fuse == "cat":
        fused = jnp.concatenate([text_fea, image_fea], axis=1)
    else:
        fused = text_fea * image_fea
    return fused @ weight.T + bias[None, :]


if __name__ == "__main__":
    key = jax.random.PRNGKey(0)
    B, D, N = 8, 32, 16  # batch, vis_dim (clip_model.visual.output_dim), n_cls

    k_t, k_i, k_wc, k_bc, k_wm, k_bm = jax.random.split(key, 6)
    text_fea = jax.random.normal(k_t, (B, D), dtype=jnp.float32)
    image_fea = jax.random.normal(k_i, (B, D), dtype=jnp.float32)

    # Deterministic synthetic nn.Linear parameters (PyTorch layout: (n_cls, in_fea)).
    w_cat = jax.random.normal(k_wc, (N, 2 * D), dtype=jnp.float32) * 0.02
    b_cat = jax.random.normal(k_bc, (N,), dtype=jnp.float32) * 0.02
    w_mul = jax.random.normal(k_wm, (N, D), dtype=jnp.float32) * 0.02
    b_mul = jax.random.normal(k_bm, (N,), dtype=jnp.float32) * 0.02

    ok = True
    for fuse, w, b in (("cat", w_cat, b_cat), ("mul", w_mul, b_mul)):
        ref = _reference(text_fea, image_fea, w, b, fuse)

        # f32 path (exact check).
        params = prepare_cls_head_params(w, b, fuse=fuse, vis_dim=D)
        out = jax.block_until_ready(cls_head_v1_apply(params, text_fea, image_fea))
        ok &= (out.shape == ref.shape) and bool(
            jnp.allclose(out, ref, atol=1e-5, rtol=1e-5))

        # bf16 MXU path (production recommendation): bf16 operands, f32 accumulate.
        params_bf16 = prepare_cls_head_params(
            w, b, fuse=fuse, vis_dim=D, compute_dtype=jnp.bfloat16)
        out_bf16 = jax.block_until_ready(
            cls_head_v1_apply(params_bf16, text_fea, image_fea))
        ok &= (out_bf16.shape == ref.shape) and bool(
            jnp.allclose(out_bf16, ref, atol=3e-2, rtol=3e-2))

    if ok:
        print("KERNEL_OK")
</pallas_src>

<mosaic_0001>
module attributes {stable_mosaic.version = 11 : i64} {
  func.func @_cat_kernel(%arg0: i32, %arg1: i32, %arg2: memref<8x32xf32, #tpu.memory_space<vmem>>, %arg3: memref<8x32xf32, #tpu.memory_space<vmem>>, %arg4: memref<32x128xf32, #tpu.memory_space<vmem>>, %arg5: memref<32x128xf32, #tpu.memory_space<vmem>>, %arg6: memref<1x128xf32, #tpu.memory_space<vmem>>, %arg7: memref<8x128xf32, #tpu.memory_space<vmem>>) attributes {dimension_semantics = [#tpu.dimension_semantics<parallel>, #tpu.dimension_semantics<parallel>], iteration_bounds = array<i64: 1, 1>, scalar_prefetch = 0 : i64, scratch_operands = 0 : i64, tpu.core_type = #tpu.core_type<tc>, window_params = [{transform_indices = @transform_0, window_bounds = array<i64: 8, 32>}, {transform_indices = @transform_1, window_bounds = array<i64: 8, 32>}, {transform_indices = @transform_2, window_bounds = array<i64: 32, 128>}, {transform_indices = @transform_3, window_bounds = array<i64: 32, 128>}, {transform_indices = @transform_4, window_bounds = array<i64: 1, 128>}, {transform_indices = @transform_5, window_bounds = array<i64: 8, 128>}]} {
    %c0 = arith.constant 0 : index
    %c0_0 = arith.constant 0 : index
    %0 = vector.load %arg2[%c0, %c0_0] : memref<8x32xf32, #tpu.memory_space<vmem>>, vector<8x32xf32>
    %c0_1 = arith.constant 0 : index
    %c0_2 = arith.constant 0 : index
    %1 = vector.load %arg4[%c0_1, %c0_2] : memref<32x128xf32, #tpu.memory_space<vmem>>, vector<32x128xf32>
    %cst = arith.constant dense<0.000000e+00> : vector<8x128xf32>
    %2 = tpu.matmul %0, %1, %cst {dimension_numbers = #tpu.dot_dimension_numbers<[1], [0], [0], [1], [0, 0, 1, 1], [], []>} : vector<8x32xf32>, vector<32x128xf32>, vector<8x128xf32> -> vector<8x128xf32>
    %c0_3 = arith.constant 0 : index
    %c0_4 = arith.constant 0 : index
    %3 = vector.load %arg3[%c0_3, %c0_4] : memref<8x32xf32, #tpu.memory_space<vmem>>, vector<8x32xf32>
    %c0_5 = arith.constant 0 : index
    %c0_6 = arith.constant 0 : index
    %4 = vector.load %arg5[%c0_5, %c0_6] : memref<32x128xf32, #tpu.memory_space<vmem>>, vector<32x128xf32>
    %cst_7 = arith.constant dense<0.000000e+00> : vector<8x128xf32>
    %5 = tpu.matmul %3, %4, %cst_7 {dimension_numbers = #tpu.dot_dimension_numbers<[1], [0], [0], [1], [0, 0, 1, 1], [], []>} : vector<8x32xf32>, vector<32x128xf32>, vector<8x128xf32> -> vector<8x128xf32>
    %6 = arith.addf %2, %5 : vector<8x128xf32>
    %c0_8 = arith.constant 0 : index
    %c0_9 = arith.constant 0 : index
    %7 = vector.load %arg6[%c0_8, %c0_9] : memref<1x128xf32, #tpu.memory_space<vmem>>, vector<1x128xf32>
    %8 = vector.broadcast %7 : vector<1x128xf32> to vector<8x128xf32>
    %9 = arith.addf %6, %8 : vector<8x128xf32>
    %c0_10 = arith.constant 0 : index
    %c0_11 = arith.constant 0 : index
    %10 = vector.load %arg7[%c0_10, %c0_11] : memref<8x128xf32, #tpu.memory_space<vmem>>, vector<8x128xf32>
    tpu.vector_store %arg7[%c0_10, %c0_11], %9 {strides = array<i32>} : memref<8x128xf32, #tpu.memory_space<vmem>>, vector<8x128xf32>,
    return
  }
  func.func @transform_0(%arg0: i32, %arg1: i32) -> (i32, i32) {
    %c0_i32 = arith.constant 0 : i32
    %c0_i32_0 = arith.constant 0 : i32
    return %arg0, %c0_i32 : i32, i32
  }
  func.func @transform_1(%arg0: i32, %arg1: i32) -> (i32, i32) {
    %c0_i32 = arith.constant 0 : i32
    %c0_i32_0 = arith.constant 0 : i32
    return %arg0, %c0_i32 : i32, i32
  }
  func.func @transform_2(%arg0: i32, %arg1: i32) -> (i32, i32) {
    %c0_i32 = arith.constant 0 : i32
    %c0_i32_0 = arith.constant 0 : i32
    return %c0_i32, %arg1 : i32, i32
  }
  func.func @transform_3(%arg0: i32, %arg1: i32) -> (i32, i32) {
    %c0_i32 = arith.constant 0 : i32
    %c0_i32_0 = arith.constant 0 : i32
    return %c0_i32, %arg1 : i32, i32
  }
  func.func @transform_4(%arg0: i32, %arg1: i32) -> (i32, i32) {
    %c0_i32 = arith.constant 0 : i32
    %c0_i32_0 = arith.constant 0 : i32
    return %c0_i32, %arg1 : i32, i32
  }
  func.func @transform_5(%arg0: i32, %arg1: i32) -> (i32, i32) {
    %c0_i32 = arith.constant 0 : i32
    return %arg0, %arg1 : i32, i32
  }
}

</mosaic_0001>

<bundles_post_ra>
// kernel: tpu_custom_call.1
= control target key start
LH: loop header
LB: loop body
LE: loop exit
PB: predicated region body
PF: predicated region fallthrough
CT: control target
= control target key end

     0   :  { %10 = vsyncpa [#allocation3], 0  ;;  %s533_s0 = inlined_call_operand.hbm [shape: f32[8,32], index: 0, kind: input, shape index: {}]   ;;  %s534_s1 = inlined_call_operand.hbm [shape: f32[8,32], index: 1, kind: input, shape index: {}]   ;;  %s535_s2 = inlined_call_operand.hbm [shape: f32[32,128], index: 2, kind: input, shape index: {}]   ;;  %s536_s3 = inlined_call_operand.hbm [shape: f32[32,128], index: 3, kind: input, shape index: {}]   ;;  %s537_s4 = inlined_call_operand.vmem [shape: f32[1,128], index: 4, kind: input, shape index: {}]   ;;  %s538_s5 = inlined_call_operand.hbm [shape: f32[8,128], index: 5, kind: output, shape index: {}]  }
   0x1   :  { %11 = vsyncpa [#allocation6], 0 }
   0x2   :  { %12 = vsyncpa [#allocation9], 0 }
   0x3   :  { %13 = vsyncpa [#allocation4], 0  ;;  %s430_s18 = smov [#allocation5]   ;;  %s431_s20 = smov [#allocation2]  }
   0x4   :  { %s30_s19 = sshll.u32 %s430_s18, 4  ;;  %s20_s21 = sshll.u32 %s431_s20, 4  ;;  %s31_s19 = int_to_ptr.vmem [resolvable:$true] %s30_s19  ;;  %s21_s21 = int_to_ptr.vmem [resolvable:$true] %s20_s21 }
   0x5   :  { %s312_s24 = scalar_lea.hbm %s534_s1, 128 }
   0x6   :  { %p313_p0 = scmp.ne.s32.totalorder %s534_s1, %s312_s24  ;;  %p316_p1 = scmp.lt.u32.totalorder %s312_s24, %s534_s1 }
   0x8   :  { %p318_p2 = pnand %p316_p1, %p313_p0 }
   0xa   :  { %321 = shalt.err (!%p318_p2)
}
   0xb   :  { %s322_s29 = scalar_lea.vmem %s31_s19, 128  ;;  %p327_p4 = scmp.lt.s32.totalorder %s31_s19, %s31_s19 }
   0xc   :  { %p323_p3 = scmp.ne.s32.totalorder %s31_s19, %s322_s29  ;;  %p328_p5 = scmp.lt.s32.totalorder %s322_s29, %s322_s29 }
   0xe   :  { %p329_p6 = por %p328_p5, %p327_p4 }
  0x10   :  { %p330_p7 = pnand %p329_p6, %p323_p3 }
  0x12   :  { %333 = shalt.err (!%p330_p7)
}
  0x13   :  { %33 = dma.hbm_to_vmem [thread:$0]  %s534_s1, 128, %s31_s19, [#allocation6]  }
  0x14   :  { %s334_s9 = scalar_lea.hbm %s533_s0, 128 }
  0x15   :  { %p335_p8 = scmp.ne.s32.totalorder %s533_s0, %s334_s9  ;;  %p338_p9 = scmp.lt.u32.totalorder %s334_s9, %s533_s0 }
  0x17   :  { %p340_p10 = pnand %p338_p9, %p335_p8 }
  0x19   :  { %343 = shalt.err (!%p340_p10)
}
  0x1a   :  { %s344_s14 = scalar_lea.vmem %s21_s21, 128  ;;  %p349_p12 = scmp.lt.s32.totalorder %s21_s21, %s21_s21 }
  0x1b   :  { %p345_p11 = scmp.ne.s32.totalorder %s21_s21, %s344_s14  ;;  %p350_p13 = scmp.lt.s32.totalorder %s344_s14, %s344_s14 }
  0x1d   :  { %p351_p0 = por %p350_p13, %p349_p12 }
  0x1f   :  { %p352_p1 = pnand %p351_p0, %p345_p11 }
  0x21   :  { %355 = shalt.err (!%p352_p1)
}
  0x22   :  { %23 = dma.hbm_to_vmem [thread:$0]  %s533_s0, 128, %s21_s21, [#allocation3]  }
  0x23   :  { %s432_s16 = smov [#allocation7]   ;;  %s356_s20 = scalar_lea.hbm %s535_s2, 512 }
  0x24   :  { %s39_s17 = sshll.u32 %s432_s16, 4  ;;  %p357_p2 = scmp.ne.s32.totalorder %s535_s2, %s356_s20  ;;  %s40_s17 = int_to_ptr.vmem [resolvable:$true] %s39_s17 }
  0x25   :  { %p360_p3 = scmp.lt.u32.totalorder %s356_s20, %s535_s2 }
  0x27   :  { %p362_p4 = pnand %p360_p3, %p357_p2 }
  0x29   :  { %365 = shalt.err (!%p362_p4)
}
  0x2a   :  { %s366_s26 = scalar_lea.vmem %s40_s17, 512  ;;  %p371_p6 = scmp.lt.s32.totalorder %s40_s17, %s40_s17 }
  0x2b   :  { %p367_p5 = scmp.ne.s32.totalorder %s40_s17, %s366_s26  ;;  %p372_p7 = scmp.lt.s32.totalorder %s366_s26, %s366_s26 }
  0x2d   :  { %p373_p8 = por %p372_p7, %p371_p6 }
  0x2f   :  { %p374_p9 = pnand %p373_p8, %p367_p5 }
  0x31   :  { %377 = shalt.err (!%p374_p9)
}
  0x32   :  { %s433_s0 = smov 128   ;;  %s434_s21 = smov 8  }
  0x33   :  { %45 = dma.hbm_to_vmem [thread:$0]  %s535_s2, 512, %s40_s17, [#allocation6], %s433_s0, %s433_s0, %s434_s21  }
  0x34   :  { %s435_s29 = smov [#allocation8]   ;;  %s378_s8 = scalar_lea.hbm %s536_s3, 512 }
  0x35   :  { %s51_s30 = sshll.u32 %s435_s29, 4  ;;  %p379_p10 = scmp.ne.s32.totalorder %s536_s3, %s378_s8  ;;  %s52_s30 = int_to_ptr.vmem [resolvable:$true] %s51_s30 }
  0x36   :  { %p382_p11 = scmp.lt.u32.totalorder %s378_s8, %s536_s3 }
  0x38   :  { %p384_p12 = pnand %p382_p11, %p379_p10 }
  0x3a   :  { %387 = shalt.err (!%p384_p12)
}
  0x3b   :  { %s388_s13 = scalar_lea.vmem %s52_s30, 512  ;;  %p393_p0 = scmp.lt.s32.totalorder %s52_s30, %s52_s30 }
  0x3c   :  { %p389_p13 = scmp.ne.s32.totalorder %s52_s30, %s388_s13  ;;  %p394_p1 = scmp.lt.s32.totalorder %s388_s13, %s388_s13 }
  0x3e   :  { %p395_p2 = por %p394_p1, %p393_p0 }
  0x40   :  { %p396_p3 = pnand %p395_p2, %p389_p13 }
  0x42   :  { %399 = shalt.err (!%p396_p3)
}
  0x43   :  { %57 = dma.hbm_to_vmem [thread:$0]  %s536_s3, 512, %s52_s30, [#allocation9], %s433_s0, %s433_s0, %s434_s21  }
  0x44   :  { %422 = dma.done.wait [#allocation3], 128  }
  0x45   :  { %423 = vsyncadd [#allocation3], 4294967168 }
  0x46   :  { %424 = dma.done.wait [#allocation6], 640  }
  0x47   :  { %425 = vsyncadd [#allocation6], 4294966656 }
  0x48   :  { %426 = dma.done.wait [#allocation9], 512  }
  0x49   :  { %427 = vsyncadd [#allocation9], 4294966784  ;;  %v436_v0 = vmov 0.0|0.0   ;;  %vm437_vm0 = vmmov 0   ;;  %v438_v1 = vmov 0.0   ;;  %v78_v2 = vld [vmem:[#allocation8] sm:$0xff] }
  0x4a   :  { %290 = vmatprep.subr.bf16.mxu0 %v436_v0  ;;  %296 = vmatprep.subr.bf16.mxu1 %v436_v0  ;;  %v79_v3 = vld [vmem:[#allocation8 + $0x8] sm:$0xff]  ;;  %v73_v4 = vld [vmem:[#allocation7] sm:$0xff]  ;;  %v80_v7 = vld [vmem:[#allocation8 + $0x10] sm:$0xff]  ;;  %vm82_vm1 = vcmask 261120   ;;  %s439_s15 = smov [#allocation10]  }
  0x4b   :  { %276 = vmatprep.mubr.msk.f32.mxu0 %vm437_vm0, %v438_v1  ;;  %287 = vmatprep.mubr.msk.f32.mxu1 %vm437_vm0, %v438_v1  ;;  %v291_v5 = vpack.c.bf16 %v79_v3, %v78_v2  ;;  %v74_v6 = vld [vmem:[#allocation7 + $0x8] sm:$0xff]  ;;  %v81_v8 = vld [vmem:[#allocation8 + $0x18] sm:$0xff]  ;;  %v75_v10 = vld [vmem:[#allocation7 + $0x10] sm:$0xff]  ;;  %s244_s16 = sshll.u32 %s439_s15, 4  ;;  %s245_s16 = int_to_ptr.vmem [resolvable:$true] %s244_s16 }
  0x4c   :  { %v297_v9 = vpack.c.bf16 %v74_v6, %v73_v4  ;;  %v76_v11 = vld [vmem:[#allocation7 + $0x18] sm:$0xff]  ;;  %v294_v12 = vpack.c.bf16 %v81_v8, %v80_v7  ;;  %v72_v15 = vld [vmem:[#allocation2] sm:$0xff]  ;;  %s400_s17 = scalar_lea.vmem %s245_s16, 128  ;;  %p405_p5 = scmp.lt.s32.totalorder %s245_s16, %s245_s16 }
  0x4d   :  { %292 = vmatpush3.bf16.msra.mxu0 %v291_v5  ;;  %v300_v13 = vpack.c.bf16 %v76_v11, %v75_v10  ;;  %v77_v14 = vld [vmem:[#allocation5] sm:$0xff]  ;;  %v257_v18 = vld [vmem:[%s537_s4] ss:$0 sm:$0xff]  ;;  %p401_p4 = scmp.ne.s32.totalorder %s245_s16, %s400_s17  ;;  %p406_p6 = scmp.lt.s32.totalorder %s400_s17, %s400_s17 }
  0x4e   :  { %298 = vmatpush3.bf16.msra.mxu1 %v297_v9  ;;  %293 = vmatprep.subr.bf16.mxu0 %v436_v0 }
  0x4f   :  { %299 = vmatprep.subr.bf16.mxu1 %v436_v0  ;;  %p407_p7 = por %p406_p6, %p405_p5 }
  0x51   :  { %295 = vmatpush3.bf16.msra.mxu0 %v294_v12  ;;  %p408_p8 = pnand %p407_p7, %p401_p4 }
  0x52   :  { %301 = vmatpush3.bf16.msra.mxu1 %v300_v13 }
  0x54   :  { %277 = vmatmul.mubr.msk.f32.vlgmr.msra.gmra.mrb[0].mxu0 %vm82_vm1, %v77_v14 }
  0x55   :  { %288 = vmatmul.mubr.msk.f32.vlgmr.msra.gmra.mrb[0].mxu1 %vm82_vm1, %v72_v15 }
 0x127   :  { %v152_v16 = vpop.f32.mrb[0].mxu0 }
 0x128   :  { %v225_v17 = vpop.f32.mrb[0].mxu1  ;;  %v278_v19 = vpop.f32.mrb[1].mxu0 }
 0x129   :  { %v226_v20 = vadd.f32 %v225_v17, %v152_v16  ;;  %v289_v21 = vpop.f32.mrb[1].mxu1 }
 0x12b   :  { %v236_v22 = vadd.f32 %v257_v18, %v226_v20 }
 0x12d   :  { %237 = vst [vmem:[#allocation10] sm:$0xff] %v236_v22 }
 0x12e   :  { %411 = shalt.err (!%p408_p8)
}
 0x12f   :  { %s412_s20 = scalar_lea.hbm %s538_s5, 128 }
 0x130   :  { %p413_p9 = scmp.ne.s32.totalorder %s538_s5, %s412_s20  ;;  %p416_p10 = scmp.lt.u32.totalorder %s412_s20, %s538_s5 }
 0x132   :  { %p418_p11 = pnand %p416_p10, %p413_p9 }
 0x134   :  { %421 = shalt.err (!%p418_p11)
}
 0x135   :  { %247 = dma.vmem_to_hbm [thread:$0]  %s245_s16, 128, %s538_s5, [#allocation4]  }
 0x136   :  { %428 = dma.done.wait [#allocation4], 128  }
 0x137   :  { %429 = vsyncadd [#allocation4], 4294967168 }
 0x138   :  { %251 = vsyncpa [#allocation3], 1 }
 0x139   :  { %252 = vsyncpa [#allocation6], 1 }
 0x13a   :  { %253 = vsyncpa [#allocation9], 1 }
 0x13b   :  { %254 = vsyncpa [#allocation4], 1 }

</bundles_post_ra>
